<compile_context>
chip_gen: v6e
topology: v6e:2x2x1
jax: 0.10.0
libtpu: 0.0.40
codegen_flags: <defaults>
</compile_context>

<pallas_src>
import functools

import jax
import jax.numpy as jnp
from jax.experimental import pallas as pl
from jax.experimental.pallas import tpu as pltpu

LANE = 128
BF16_SUBLANE = 16          # bf16 packs 16 rows per vreg
_NAMES = ("1", "2", "3", "4", "o")


def _round_up(n, m):
    return (n + m - 1) // m * m


def _cdiv(a, b):
    return (a + b - 1) // b


def dnn_kernel(x_ref,
               w1_ref, b1_ref,
               w2_ref, b2_ref,
               w3_ref, b3_ref,
               w4_ref, b4_ref,
               wo_ref, bo_ref,
               out_ref):
    """fc1..fc4 (+ReLU) -> out.  bf16 MXU operands, f32 accumulate/epilogue."""
    # fc1 -> (drop) -> relu
    h = jnp.dot(x_ref[...], w1_ref[...], preferred_element_type=jnp.float32)
    h = jnp.maximum(h + b1_ref[...], 0.0)
    # fc2 -> (drop) -> relu
    h = jnp.dot(h.astype(jnp.bfloat16), w2_ref[...],
                preferred_element_type=jnp.float32)
    h = jnp.maximum(h + b2_ref[...], 0.0)
    # fc3 -> relu -> (drop)
    h = jnp.dot(h.astype(jnp.bfloat16), w3_ref[...],
                preferred_element_type=jnp.float32)
    h = jnp.maximum(h + b3_ref[...], 0.0)
    # fc4 -> relu
    h = jnp.dot(h.astype(jnp.bfloat16), w4_ref[...],
                preferred_element_type=jnp.float32)
    h = jnp.maximum(h + b4_ref[...], 0.0)
    # out (no activation); write bf16 to halve output HBM traffic
    y = jnp.dot(h.astype(jnp.bfloat16), wo_ref[...],
                preferred_element_type=jnp.float32)
    out_ref[...] = (y + bo_ref[...]).astype(out_ref.dtype)


def pack_params(params, input_size):
    """One-time packing (hoisted out of the per-call path): bf16 weights,
    f32 biases, output (N) dims zero-padded to multiples of 128.  The layer-1
    contraction dim (input_size) is left UNPADDED."""
    packed = {}
    prev = input_size
    for name in _NAMES:
        w = params[f"w{name}"].astype(jnp.bfloat16)
        b = params[f"b{name}"].astype(jnp.float32)
        k, n = w.shape
        n_pad = _round_up(n, LANE)
        packed[f"w{name}"] = jnp.pad(w, ((0, prev - k), (0, n_pad - n)))
        packed[f"b{name}"] = jnp.pad(b, ((0, 0), (0, n_pad - n)))
        prev = n_pad
    return packed


@functools.partial(jax.jit, static_argnames=("out_size", "tile_b"))
def dnn_forward(x, packed, *, out_size, tile_b=1024):
    """x: (B, input_size) f32; packed: output of pack_params (bf16/f32)."""
    B, in_size = x.shape
    out_p = packed["wo"].shape[1]

    # ---- batch tiling: minimal padding, 16-row aligned, >=2 steps when B is
    # large enough so the parallel axis shards across v7x's 2 TensorCores.
    n_steps = max(1, _cdiv(B, tile_b))
    if B >= 2 * BF16_SUBLANE:
        n_steps = max(n_steps, 2)
    TB = _round_up(_cdiv(B, n_steps), BF16_SUBLANE)
    B_pad = _round_up(B, TB)
    grid = (B_pad // TB,)

    x_p = jnp.pad(x.astype(jnp.bfloat16), ((0, B_pad - B), (0, 0)))

    const_map = lambda i: (0, 0)               # weights/biases resident in VMEM
    wb_specs, wb_args = [], []
    for name in _NAMES:
        w = packed[f"w{name}"]
        b = packed[f"b{name}"]
        wb_specs.append(pl.BlockSpec(w.shape, const_map))
        wb_specs.append(pl.BlockSpec(b.shape, const_map))
        wb_args.extend([w, b])

    # ---- advisory cost estimate (real HBM traffic, not padded fantasy) ------
    flops = 2 * B_pad * sum(
        packed[f"w{n}"].shape[0] * packed[f"w{n}"].shape[1] for n in _NAMES)
    wb_bytes = sum(packed[f"w{n}"].size * 2 + packed[f"b{n}"].size * 4
                   for n in _NAMES)
    bytes_accessed = x_p.size * 2 + wb_bytes + B_pad * out_p * 2

    # ---- VMEM guard: resident weights + double-buffered x/out + f32 interm --
    max_np = max(packed[f"w{n}"].shape[1] for n in _NAMES)
    vmem_est = (wb_bytes
                + 2 * TB * in_size * 2      # double-buffered x block (bf16)
                + 2 * TB * out_p * 2        # double-buffered out block (bf16)
                + 2 * TB * max_np * 4)      # f32 intermediate live set (rough)
    # TODO(synk): if vmem_est ever nears v7x's 64 MiB VMEM (huge hidden dims),
    # tile the largest layer over a K/N grid axis instead of keeping all
    # weights resident.
    vmem_limit = int(min(64 * 2**20, max(32 * 2**20, 2 * vmem_est)))

    out = pl.pallas_call(
        dnn_kernel,
        out_shape=jax.ShapeDtypeStruct((B_pad, out_p), jnp.bfloat16),
        grid=grid,
        in_specs=[pl.BlockSpec((TB, in_size), lambda i: (i, 0))] + wb_specs,
        out_specs=pl.BlockSpec((TB, out_p), lambda i: (i, 0)),
        compiler_params=pltpu.CompilerParams(
            dimension_semantics=("parallel",),
            vmem_limit_bytes=vmem_limit),
        cost_estimate=pl.CostEstimate(
            flops=flops, transcendentals=0, bytes_accessed=bytes_accessed),
    )(x_p, *wb_args)

    return out[:B, :out_size].astype(jnp.float32)


def init_params(key, input_size, h1, h2, h3, h4, output_size):
    """Deterministic init mimicking nn.Linear's U(-1/sqrt(fan_in), 1/sqrt(fan_in))."""
    dims = [(input_size, h1), (h1, h2), (h2, h3), (h3, h4), (h4, output_size)]
    params = {}
    for (fan_in, fan_out), name in zip(dims, _NAMES):
        key, kw, kb = jax.random.split(key, 3)
        bound = 1.0 / (fan_in ** 0.5)
        # stored transposed relative to PyTorch (in, out) so kernel does x @ W
        params[f"w{name}"] = jax.random.uniform(
            kw, (fan_in, fan_out), jnp.float32, -bound, bound)
        params[f"b{name}"] = jax.random.uniform(
            kb, (1, fan_out), jnp.float32, -bound, bound)
    return params


def dnn_reference(x, params):
    """Plain-JAX reference mirroring the kernel's bf16-operand / f32-accumulate math."""
    def lin(a, w, b):
        return jnp.dot(a.astype(jnp.bfloat16), w.astype(jnp.bfloat16),
                       preferred_element_type=jnp.float32) + b
    h = jnp.maximum(lin(x, params["w1"], params["b1"]), 0.0)
    h = jnp.maximum(lin(h, params["w2"], params["b2"]), 0.0)
    h = jnp.maximum(lin(h, params["w3"], params["b3"]), 0.0)
    h = jnp.maximum(lin(h, params["w4"], params["b4"]), 0.0)
    return lin(h, params["wo"], params["bo"])


if __name__ == "__main__":
    input_size, h1, h2, h3, h4, output_size = 32, 64, 64, 32, 32, 16
    batch = 8

    key = jax.random.PRNGKey(0)
    key, kx = jax.random.split(key)
    x = jax.random.normal(kx, (batch, input_size), jnp.float32)
    params = init_params(key, input_size, h1, h2, h3, h4, output_size)

    # One-time packing (hoisted out of the per-call path).
    packed = pack_params(params, input_size)
    packed = jax.tree_util.tree_map(jax.block_until_ready, packed)

    out = dnn_forward(x, packed, out_size=output_size)
    out = jax.block_until_ready(out)

    ref = dnn_reference(x, params)
    assert out.shape == (batch, output_size)
    assert jnp.allclose(out, ref, atol=2e-2, rtol=2e-2), \
        f"max abs err {jnp.max(jnp.abs(out - ref))}"

    print("KERNEL_OK")
</pallas_src>

<mosaic_0001>
module attributes {stable_mosaic.version = 11 : i64} {
  func.func @dnn_kernel(%arg0: i32, %arg1: memref<16x32xbf16, #tpu.memory_space<vmem>>, %arg2: memref<32x128xbf16, #tpu.memory_space<vmem>>, %arg3: memref<1x128xf32, #tpu.memory_space<vmem>>, %arg4: memref<128x128xbf16, #tpu.memory_space<vmem>>, %arg5: memref<1x128xf32, #tpu.memory_space<vmem>>, %arg6: memref<128x128xbf16, #tpu.memory_space<vmem>>, %arg7: memref<1x128xf32, #tpu.memory_space<vmem>>, %arg8: memref<128x128xbf16, #tpu.memory_space<vmem>>, %arg9: memref<1x128xf32, #tpu.memory_space<vmem>>, %arg10: memref<128x128xbf16, #tpu.memory_space<vmem>>, %arg11: memref<1x128xf32, #tpu.memory_space<vmem>>, %arg12: memref<16x128xbf16, #tpu.memory_space<vmem>>) attributes {dimension_semantics = [#tpu.dimension_semantics<parallel>], iteration_bounds = array<i64: 1>, scalar_prefetch = 0 : i64, scratch_operands = 0 : i64, tpu.core_type = #tpu.core_type<tc>, window_params = [{transform_indices = @transform_0, window_bounds = array<i64: 16, 32>}, {pipeline_mode = #tpu.pipeline_mode<synchronous>, transform_indices = @transform_1, window_bounds = array<i64: 32, 128>}, {pipeline_mode = #tpu.pipeline_mode<synchronous>, transform_indices = @transform_2, window_bounds = array<i64: 1, 128>}, {pipeline_mode = #tpu.pipeline_mode<synchronous>, transform_indices = @transform_3, window_bounds = array<i64: 128, 128>}, {pipeline_mode = #tpu.pipeline_mode<synchronous>, transform_indices = @transform_4, window_bounds = array<i64: 1, 128>}, {pipeline_mode = #tpu.pipeline_mode<synchronous>, transform_indices = @transform_5, window_bounds = array<i64: 128, 128>}, {pipeline_mode = #tpu.pipeline_mode<synchronous>, transform_indices = @transform_6, window_bounds = array<i64: 1, 128>}, {pipeline_mode = #tpu.pipeline_mode<synchronous>, transform_indices = @transform_7, window_bounds = array<i64: 128, 128>}, {pipeline_mode = #tpu.pipeline_mode<synchronous>, transform_indices = @transform_8, window_bounds = array<i64: 1, 128>}, {pipeline_mode = #tpu.pipeline_mode<synchronous>, transform_indices = @transform_9, window_bounds = array<i64: 128, 128>}, {pipeline_mode = #tpu.pipeline_mode<synchronous>, transform_indices = @transform_10, window_bounds = array<i64: 1, 128>}, {transform_indices = @transform_11, window_bounds = array<i64: 16, 128>}]} {
    %c0 = arith.constant 0 : index
    %c0_0 = arith.constant 0 : index
    %0 = vector.load %arg1[%c0, %c0_0] : memref<16x32xbf16, #tpu.memory_space<vmem>>, vector<16x32xbf16>
    %c0_1 = arith.constant 0 : index
    %c0_2 = arith.constant 0 : index
    %1 = vector.load %arg2[%c0_1, %c0_2] : memref<32x128xbf16, #tpu.memory_space<vmem>>, vector<32x128xbf16>
    %cst = arith.constant dense<0.000000e+00> : vector<16x128xf32>
    %2 = tpu.matmul %0, %1, %cst {dimension_numbers = #tpu.dot_dimension_numbers<[1], [0], [0], [1], [0, 0, 1, 1], [], []>} : vector<16x32xbf16>, vector<32x128xbf16>, vector<16x128xf32> -> vector<16x128xf32>
    %c0_3 = arith.constant 0 : index
    %c0_4 = arith.constant 0 : index
    %3 = vector.load %arg3[%c0_3, %c0_4] : memref<1x128xf32, #tpu.memory_space<vmem>>, vector<1x128xf32>
    %4 = vector.broadcast %3 : vector<1x128xf32> to vector<16x128xf32>
    %5 = arith.addf %2, %4 : vector<16x128xf32>
    %cst_5 = arith.constant 0.000000e+00 : f32
    %6 = vector.broadcast %cst_5 : f32 to vector<16x128xf32>
    %7 = arith.maximumf %5, %6 : vector<16x128xf32>
    %8 = arith.truncf %7 : vector<16x128xf32> to vector<16x128xbf16>
    %c0_6 = arith.constant 0 : index
    %c0_7 = arith.constant 0 : index
    %9 = vector.load %arg4[%c0_6, %c0_7] : memref<128x128xbf16, #tpu.memory_space<vmem>>, vector<128x128xbf16>
    %cst_8 = arith.constant dense<0.000000e+00> : vector<16x128xf32>
    %10 = tpu.matmul %8, %9, %cst_8 {dimension_numbers = #tpu.dot_dimension_numbers<[1], [0], [0], [1], [0, 0, 1, 1], [], []>} : vector<16x128xbf16>, vector<128x128xbf16>, vector<16x128xf32> -> vector<16x128xf32>
    %c0_9 = arith.constant 0 : index
    %c0_10 = arith.constant 0 : index
    %11 = vector.load %arg5[%c0_9, %c0_10] : memref<1x128xf32, #tpu.memory_space<vmem>>, vector<1x128xf32>
    %12 = vector.broadcast %11 : vector<1x128xf32> to vector<16x128xf32>
    %13 = arith.addf %10, %12 : vector<16x128xf32>
    %cst_11 = arith.constant 0.000000e+00 : f32
    %14 = vector.broadcast %cst_11 : f32 to vector<16x128xf32>
    %15 = arith.maximumf %13, %14 : vector<16x128xf32>
    %16 = arith.truncf %15 : vector<16x128xf32> to vector<16x128xbf16>
    %c0_12 = arith.constant 0 : index
    %c0_13 = arith.constant 0 : index
    %17 = vector.load %arg6[%c0_12, %c0_13] : memref<128x128xbf16, #tpu.memory_space<vmem>>, vector<128x128xbf16>
    %cst_14 = arith.constant dense<0.000000e+00> : vector<16x128xf32>
    %18 = tpu.matmul %16, %17, %cst_14 {dimension_numbers = #tpu.dot_dimension_numbers<[1], [0], [0], [1], [0, 0, 1, 1], [], []>} : vector<16x128xbf16>, vector<128x128xbf16>, vector<16x128xf32> -> vector<16x128xf32>
    %c0_15 = arith.constant 0 : index
    %c0_16 = arith.constant 0 : index
    %19 = vector.load %arg7[%c0_15, %c0_16] : memref<1x128xf32, #tpu.memory_space<vmem>>, vector<1x128xf32>
    %20 = vector.broadcast %19 : vector<1x128xf32> to vector<16x128xf32>
    %21 = arith.addf %18, %20 : vector<16x128xf32>
    %cst_17 = arith.constant 0.000000e+00 : f32
    %22 = vector.broadcast %cst_17 : f32 to vector<16x128xf32>
    %23 = arith.maximumf %21, %22 : vector<16x128xf32>
    %24 = arith.truncf %23 : vector<16x128xf32> to vector<16x128xbf16>
    %c0_18 = arith.constant 0 : index
    %c0_19 = arith.constant 0 : index
    %25 = vector.load %arg8[%c0_18, %c0_19] : memref<128x128xbf16, #tpu.memory_space<vmem>>, vector<128x128xbf16>
    %cst_20 = arith.constant dense<0.000000e+00> : vector<16x128xf32>
    %26 = tpu.matmul %24, %25, %cst_20 {dimension_numbers = #tpu.dot_dimension_numbers<[1], [0], [0], [1], [0, 0, 1, 1], [], []>} : vector<16x128xbf16>, vector<128x128xbf16>, vector<16x128xf32> -> vector<16x128xf32>
    %c0_21 = arith.constant 0 : index
    %c0_22 = arith.constant 0 : index
    %27 = vector.load %arg9[%c0_21, %c0_22] : memref<1x128xf32, #tpu.memory_space<vmem>>, vector<1x128xf32>
    %28 = vector.broadcast %27 : vector<1x128xf32> to vector<16x128xf32>
    %29 = arith.addf %26, %28 : vector<16x128xf32>
    %cst_23 = arith.constant 0.000000e+00 : f32
    %30 = vector.broadcast %cst_23 : f32 to vector<16x128xf32>
    %31 = arith.maximumf %29, %30 : vector<16x128xf32>
    %32 = arith.truncf %31 : vector<16x128xf32> to vector<16x128xbf16>
    %c0_24 = arith.constant 0 : index
    %c0_25 = arith.constant 0 : index
    %33 = vector.load %arg10[%c0_24, %c0_25] : memref<128x128xbf16, #tpu.memory_space<vmem>>, vector<128x128xbf16>
    %cst_26 = arith.constant dense<0.000000e+00> : vector<16x128xf32>
    %34 = tpu.matmul %32, %33, %cst_26 {dimension_numbers = #tpu.dot_dimension_numbers<[1], [0], [0], [1], [0, 0, 1, 1], [], []>} : vector<16x128xbf16>, vector<128x128xbf16>, vector<16x128xf32> -> vector<16x128xf32>
    %c0_27 = arith.constant 0 : index
    %c0_28 = arith.constant 0 : index
    %35 = vector.load %arg11[%c0_27, %c0_28] : memref<1x128xf32, #tpu.memory_space<vmem>>, vector<1x128xf32>
    %36 = vector.broadcast %35 : vector<1x128xf32> to vector<16x128xf32>
    %37 = arith.addf %34, %36 : vector<16x128xf32>
    %38 = arith.truncf %37 : vector<16x128xf32> to vector<16x128xbf16>
    %c0_29 = arith.constant 0 : index
    %c0_30 = arith.constant 0 : index
    %39 = vector.load %arg12[%c0_29, %c0_30] : memref<16x128xbf16, #tpu.memory_space<vmem>>, vector<16x128xbf16>
    tpu.vector_store %arg12[%c0_29, %c0_30], %38 {strides = array<i32>} : memref<16x128xbf16, #tpu.memory_space<vmem>>, vector<16x128xbf16>,
    return
  }
  func.func @transform_0(%arg0: i32) -> (i32, i32) {
    %c0_i32 = arith.constant 0 : i32
    %c0_i32_0 = arith.constant 0 : i32
    return %arg0, %c0_i32 : i32, i32
  }
  func.func @transform_1(%arg0: i32) -> (i32, i32) {
    %c0_i32 = arith.constant 0 : i32
    %c0_i32_0 = arith.constant 0 : i32
    %c0_i32_1 = arith.constant 0 : i32
    return %c0_i32, %c0_i32_0 : i32, i32
  }
  func.func @transform_2(%arg0: i32) -> (i32, i32) {
    %c0_i32 = arith.constant 0 : i32
    %c0_i32_0 = arith.constant 0 : i32
    %c0_i32_1 = arith.constant 0 : i32
    return %c0_i32, %c0_i32_0 : i32, i32
  }
  func.func @transform_3(%arg0: i32) -> (i32, i32) {
    %c0_i32 = arith.constant 0 : i32
    %c0_i32_0 = arith.constant 0 : i32
    %c0_i32_1 = arith.constant 0 : i32
    return %c0_i32, %c0_i32_0 : i32, i32
  }
  func.func @transform_4(%arg0: i32) -> (i32, i32) {
    %c0_i32 = arith.constant 0 : i32
    %c0_i32_0 = arith.constant 0 : i32
    %c0_i32_1 = arith.constant 0 : i32
    return %c0_i32, %c0_i32_0 : i32, i32
  }
  func.func @transform_5(%arg0: i32) -> (i32, i32) {
    %c0_i32 = arith.constant 0 : i32
    %c0_i32_0 = arith.constant 0 : i32
    %c0_i32_1 = arith.constant 0 : i32
    return %c0_i32, %c0_i32_0 : i32, i32
  }
  func.func @transform_6(%arg0: i32) -> (i32, i32) {
    %c0_i32 = arith.constant 0 : i32
    %c0_i32_0 = arith.constant 0 : i32
    %c0_i32_1 = arith.constant 0 : i32
    return %c0_i32, %c0_i32_0 : i32, i32
  }
  func.func @transform_7(%arg0: i32) -> (i32, i32) {
    %c0_i32 = arith.constant 0 : i32
    %c0_i32_0 = arith.constant 0 : i32
    %c0_i32_1 = arith.constant 0 : i32
    return %c0_i32, %c0_i32_0 : i32, i32
  }
  func.func @transform_8(%arg0: i32) -> (i32, i32) {
    %c0_i32 = arith.constant 0 : i32
    %c0_i32_0 = arith.constant 0 : i32
    %c0_i32_1 = arith.constant 0 : i32
    return %c0_i32, %c0_i32_0 : i32, i32
  }
  func.func @transform_9(%arg0: i32) -> (i32, i32) {
    %c0_i32 = arith.constant 0 : i32
    %c0_i32_0 = arith.constant 0 : i32
    %c0_i32_1 = arith.constant 0 : i32
    return %c0_i32, %c0_i32_0 : i32, i32
  }
  func.func @transform_10(%arg0: i32) -> (i32, i32) {
    %c0_i32 = arith.constant 0 : i32
    %c0_i32_0 = arith.constant 0 : i32
    %c0_i32_1 = arith.constant 0 : i32
    return %c0_i32, %c0_i32_0 : i32, i32
  }
  func.func @transform_11(%arg0: i32) -> (i32, i32) {
    %c0_i32 = arith.constant 0 : i32
    %c0_i32_0 = arith.constant 0 : i32
    return %arg0, %c0_i32 : i32, i32
  }
}

</mosaic_0001>

<bundles_post_ra>
// kernel: dnn_forward.1
= control target key start
LH: loop header
LB: loop body
LE: loop exit
PB: predicated region body
PF: predicated region fallthrough
CT: control target
= control target key end

     0   :  { %16 = vsyncpa [#allocation3], 0  ;;  %s1115_s0 = inlined_call_operand.vmem [shape: bf16[16,32], index: 0, kind: input, shape index: {}]   ;;  %s1116_s1 = inlined_call_operand.vmem [shape: bf16[32,128], index: 1, kind: input, shape index: {}]   ;;  %s1117_s2 = inlined_call_operand.vmem [shape: f32[1,128], index: 2, kind: input, shape index: {}]   ;;  %s1118_s3 = inlined_call_operand.hbm [shape: bf16[128,128], index: 3, kind: input, shape index: {}]   ;;  %s1119_s4 = inlined_call_operand.vmem [shape: f32[1,128], index: 4, kind: input, shape index: {}]   ;;  %s1120_s5 = inlined_call_operand.hbm [shape: bf16[128,128], index: 5, kind: input, shape index: {}]   ;;  %s1121_s6 = inlined_call_operand.vmem [shape: f32[1,128], index: 6, kind: input, shape index: {}]   ;;  %s1122_s7 = inlined_call_operand.hbm [shape: bf16[128,128], index: 7, kind: input, shape index: {}]   ;;  %s1123_s8 = inlined_call_operand.vmem [shape: f32[1,128], index: 8, kind: input, shape index: {}]   ;;  %s1124_s9 = inlined_call_operand.hbm [shape: bf16[128,128], index: 9, kind: input, shape index: {}]   ;;  %s1125_s10 = inlined_call_operand.vmem [shape: f32[1,128], index: 10, kind: input, shape index: {}]   ;;  %s1126_s11 = inlined_call_operand.vmem [shape: bf16[16,128], index: 11, kind: output, shape index: {}]  }
   0x1   :  { %17 = vsyncpa [#allocation5], 0 }
   0x2   :  { %18 = vsyncpa [#allocation8], 0  ;;  %s952_s17 = smov [#allocation4]   ;;  %s953_s19 = smov [#allocation2]  }
   0x3   :  { %s44_s18 = sshll.u32 %s952_s17, 4  ;;  %s30_s20 = sshll.u32 %s953_s19, 4  ;;  %s45_s18 = int_to_ptr.vmem [resolvable:$true] %s44_s18  ;;  %s31_s20 = int_to_ptr.vmem [resolvable:$true] %s30_s20 }
   0x4   :  { %s874_s21 = scalar_lea.vmem %s45_s18, 1024  ;;  %p879_p1 = scmp.lt.s32.totalorder %s45_s18, %s45_s18 }
   0x5   :  { %p875_p0 = scmp.ne.s32.totalorder %s45_s18, %s874_s21  ;;  %p880_p2 = scmp.lt.s32.totalorder %s874_s21, %s874_s21 }
   0x7   :  { %p881_p3 = por %p880_p2, %p879_p1 }
   0x9   :  { %p882_p4 = pnand %p881_p3, %p875_p0 }
   0xb   :  { %885 = shalt.err (!%p882_p4)
}
   0xc   :  { %s954_s22 = smov 64   ;;  %s955_s23 = smov 4  }
   0xd   :  { %50 = dma.hbm_to_vmem [thread:$0]  %s1120_s5, 1024, %s45_s18, [#allocation5], %s954_s22, %s954_s22, %s955_s23  }
   0xe   :  { %s894_s26 = scalar_lea.vmem %s31_s20, 1024  ;;  %p899_p6 = scmp.lt.s32.totalorder %s31_s20, %s31_s20 }
   0xf   :  { %p895_p5 = scmp.ne.s32.totalorder %s31_s20, %s894_s26  ;;  %p900_p7 = scmp.lt.s32.totalorder %s894_s26, %s894_s26 }
  0x11   :  { %p901_p8 = por %p900_p7, %p899_p6 }
  0x13   :  { %p902_p9 = pnand %p901_p8, %p895_p5 }
  0x15   :  { %905 = shalt.err (!%p902_p9)
}
  0x16   :  { %36 = dma.hbm_to_vmem [thread:$0]  %s1118_s3, 1024, %s31_s20, [#allocation3], %s954_s22, %s954_s22, %s955_s23  }
  0x17   :  { %s956_s29 = smov [#allocation6]   ;;  %s957_s12 = smov [#allocation7]  }
  0x18   :  { %s58_s30 = sshll.u32 %s956_s29, 4  ;;  %s72_s13 = sshll.u32 %s957_s12, 4  ;;  %s59_s30 = int_to_ptr.vmem [resolvable:$true] %s58_s30  ;;  %s73_s13 = int_to_ptr.vmem [resolvable:$true] %s72_s13 }
  0x19   :  { %s914_s5 = scalar_lea.vmem %s59_s30, 1024  ;;  %p919_p11 = scmp.lt.s32.totalorder %s59_s30, %s59_s30 }
  0x1a   :  { %p915_p10 = scmp.ne.s32.totalorder %s59_s30, %s914_s5  ;;  %p920_p12 = scmp.lt.s32.totalorder %s914_s5, %s914_s5 }
  0x1c   :  { %p921_p13 = por %p920_p12, %p919_p11 }
  0x1e   :  { %p922_p0 = pnand %p921_p13, %p915_p10 }
  0x20   :  { %925 = shalt.err (!%p922_p0)
}
  0x21   :  { %64 = dma.hbm_to_vmem [thread:$0]  %s1122_s7, 1024, %s59_s30, [#allocation5], %s954_s22, %s954_s22, %s955_s23  }
  0x22   :  { %s934_s3 = scalar_lea.vmem %s73_s13, 1024  ;;  %p939_p2 = scmp.lt.s32.totalorder %s73_s13, %s73_s13 }
  0x23   :  { %p935_p1 = scmp.ne.s32.totalorder %s73_s13, %s934_s3  ;;  %p940_p3 = scmp.lt.s32.totalorder %s934_s3, %s934_s3 }
  0x25   :  { %p941_p4 = por %p940_p3, %p939_p2 }
  0x27   :  { %p942_p5 = pnand %p941_p4, %p935_p1 }
  0x29   :  { %945 = shalt.err (!%p942_p5)
}
  0x2a   :  { %78 = dma.hbm_to_vmem [thread:$0]  %s1124_s9, 1024, %s73_s13, [#allocation8], %s954_s22, %s954_s22, %s955_s23  }
  0x2b   :  { %946 = dma.done.wait [#allocation3], 1024  }
  0x2c   :  { %947 = vsyncadd [#allocation3], 4294966272 }
  0x2d   :  { %948 = dma.done.wait [#allocation5], 2048  }
  0x2e   :  { %949 = vsyncadd [#allocation5], 4294965248 }
  0x2f   :  { %950 = dma.done.wait [#allocation8], 1024  }
  0x30   :  { %951 = vsyncadd [#allocation8], 4294966272  ;;  %v958_v0 = vmov 0.0   ;;  %vm959_vm0 = vmmov 0   ;;  %v831_v1 = vld [vmem:[%s1116_s1 + $0x8] sm:$0xff]   ;;  %v832_v2 = vld [vmem:[%s1116_s1] sm:$0xff]  }
  0x31   :  { %735 = vmatprep.subr.bf16.mxu0 %v958_v0  ;;  %739 = vmatprep.mubr.msk.bf16.mxu0 %vm959_vm0, %v958_v0  ;;  %v834_v3 = vld [vmem:[#allocation2 + $0x38] sm:$0xff]   ;;  %v833_v4 = vld [vmem:[%s1115_s0] sm:$0xff]   ;;  %v835_v5 = vld [vmem:[#allocation2 + $0x30] sm:$0xff]   ;;  %vm124_vm1 = vcmask 261120  }
  0x32   :  { %743 = vmatprep.subr.bf16.mxu1 %v958_v0  ;;  %759 = vmatprep.mubr.msk.bf16.mxu1 %vm959_vm0, %v958_v0  ;;  %v836_v6 = vld [vmem:[#allocation2 + $0x28] sm:$0xff]   ;;  %v837_v7 = vld [vmem:[#allocation2 + $0x20] sm:$0xff]   ;;  %v838_v8 = vld [vmem:[#allocation2 + $0x18] sm:$0xff]  }
  0x33   :  { %736 = vmatpush3.bf16.msra.mxu0 %v831_v1  ;;  %744 = vmatpush3.bf16.msra.mxu1 %v834_v3  ;;  %v839_v9 = vld [vmem:[#allocation2 + $0x10] sm:$0xff]   ;;  %v840_v10 = vld [vmem:[#allocation2 + $0x8] sm:$0xff]   ;;  %v841_v11 = vld [vmem:[#allocation2] sm:$0xff]  }
  0x34   :  { %737 = vmatprep.subr.bf16.mxu0 %v958_v0  ;;  %745 = vmatprep.subr.bf16.mxu1 %v958_v0  ;;  %v842_v12 = vld [vmem:[#allocation4 + $0x38] sm:$0xff]   ;;  %v843_v13 = vld [vmem:[#allocation4 + $0x30] sm:$0xff]   ;;  %v844_v14 = vld [vmem:[#allocation4 + $0x28] sm:$0xff]  }
  0x35   :  { %v845_v15 = vld [vmem:[#allocation4 + $0x20] sm:$0xff]   ;;  %v846_v16 = vld [vmem:[#allocation4 + $0x18] sm:$0xff]   ;;  %v847_v27 = vld [vmem:[#allocation4 + $0x10] sm:$0xff]  }
  0x36   :  { %v646_v17 = vld [vmem:[%s1117_s2] ss:$0 sm:$0xff]  ;;  %v848_v28 = vld [vmem:[#allocation4 + $0x8] sm:$0xff]   ;;  %v850_v30 = vld [vmem:[#allocation6 + $0x38] sm:$0xff]  }
  0x37   :  { %738 = vmatpush3.bf16.msra.mxu0 %v832_v2  ;;  %746 = vmatpush3.bf16.msra.mxu1 %v835_v5  ;;  %v849_v29 = vld [vmem:[#allocation4] sm:$0xff]   ;;  %v851_v31 = vld [vmem:[#allocation6 + $0x30] sm:$0xff]   ;;  %v852_v32 = vld [vmem:[#allocation6 + $0x28] sm:$0xff]  }
  0x38   :  { %763 = vmatprep.subr.bf16.mxu0 %v958_v0  ;;  %747 = vmatprep.subr.bf16.mxu1 %v958_v0  ;;  %v853_v33 = vld [vmem:[#allocation6 + $0x20] sm:$0xff]   ;;  %v854_v34 = vld [vmem:[#allocation6 + $0x18] sm:$0xff]   ;;  %v855_v45 = vld [vmem:[#allocation6 + $0x10] sm:$0xff]  }
  0x39   :  { %v651_v35 = vld [vmem:[%s1119_s4] ss:$0 sm:$0xff]  ;;  %v856_v46 = vld [vmem:[#allocation6 + $0x8] sm:$0xff]   ;;  %v858_v48 = vld [vmem:[#allocation7 + $0x38] sm:$0xff]  }
  0x3a   :  { %740 = vmatmul.mubr.msk.bf16.vlgmr.msra.gmra.mxu0 %vm124_vm1, %v833_v4  ;;  %v857_v47 = vld [vmem:[#allocation6] sm:$0xff]   ;;  %v859_v49 = vld [vmem:[#allocation7 + $0x30] sm:$0xff]   ;;  %v860_v50 = vld [vmem:[#allocation7 + $0x28] sm:$0xff]  }
  0x3b   :  { %779 = vmatprep.mubr.msk.bf16.mxu0 %vm959_vm0, %v958_v0  ;;  %748 = vmatpush3.bf16.msra.mxu1 %v836_v6  ;;  %v861_v51 = vld [vmem:[#allocation7 + $0x20] sm:$0xff]   ;;  %v862_v52 = vld [vmem:[#allocation7 + $0x18] sm:$0xff]   ;;  %v863_v63 = vld [vmem:[#allocation7 + $0x10] sm:$0xff]  }
  0x3c   :  { %749 = vmatprep.subr.bf16.mxu1 %v958_v0  ;;  %764 = vmatpush3.bf16.msra.mxu0 %v842_v12  ;;  %v660_v53 = vld [vmem:[%s1121_s6] ss:$0 sm:$0xff]  ;;  %v864_v1 = vld [vmem:[#allocation7 + $0x8] sm:$0xff]  }
  0x3d   :  { %765 = vmatprep.subr.bf16.mxu0 %v958_v0  ;;  %v865_v2 = vld [vmem:[#allocation7] sm:$0xff]  }
  0x3e   :  { %v669_v3 = vld [vmem:[%s1123_s8] ss:$0 sm:$0xff] }
  0x3f   :  { %750 = vmatpush3.bf16.msra.mxu1 %v837_v7 }
  0x40   :  { %751 = vmatprep.subr.bf16.mxu1 %v958_v0  ;;  %766 = vmatpush3.bf16.msra.mxu0 %v843_v13 }
  0x41   :  { %767 = vmatprep.subr.bf16.mxu0 %v958_v0 }
  0x43   :  { %752 = vmatpush3.bf16.msra.mxu1 %v838_v8 }
  0x44   :  { %753 = vmatprep.subr.bf16.mxu1 %v958_v0  ;;  %768 = vmatpush3.bf16.msra.mxu0 %v844_v14 }
  0x45   :  { %769 = vmatprep.subr.bf16.mxu0 %v958_v0 }
  0x47   :  { %754 = vmatpush3.bf16.msra.mxu1 %v839_v9 }
  0x48   :  { %755 = vmatprep.subr.bf16.mxu1 %v958_v0  ;;  %770 = vmatpush3.bf16.msra.mxu0 %v845_v15 }
  0x49   :  { %771 = vmatprep.subr.bf16.mxu0 %v958_v0 }
  0x4b   :  { %756 = vmatpush3.bf16.msra.mxu1 %v840_v10 }
  0x4c   :  { %757 = vmatprep.subr.bf16.mxu1 %v958_v0  ;;  %772 = vmatpush3.bf16.msra.mxu0 %v846_v16 }
  0x4d   :  { %773 = vmatprep.subr.bf16.mxu0 %v958_v0 }
  0x4f   :  { %758 = vmatpush3.bf16.msra.mxu1 %v841_v11 }
  0x50   :  { %783 = vmatprep.subr.bf16.mxu1 %v958_v0  ;;  %774 = vmatpush3.bf16.msra.mxu0 %v847_v27 }
  0x51   :  { %775 = vmatprep.subr.bf16.mxu0 %v958_v0 }
  0x54   :  { %776 = vmatpush3.bf16.msra.mxu0 %v848_v28 }
  0x55   :  { %777 = vmatprep.subr.bf16.mxu0 %v958_v0 }
  0x58   :  { %778 = vmatpush3.bf16.msra.mxu0 %v849_v29 }
  0x59   :  { %803 = vmatprep.subr.bf16.mxu0 %v958_v0 }
  0xfa   :  { %v162_v18 = vpop.f32.mrf.mxu0 }
  0xfb   :  { %v163_v20 = vadd.f32 %v646_v17, %v162_v18 }
  0xfc   :  { %v741_v19 = vpop.f32.mrf.mxu0 }
  0xfd   :  { %v169_v24 = vmax.f32 %v163_v20, 0.0 }
  0xfe   :  { %v165_v21 = vpop.f32.mrf.mxu0 }
  0xff   :  { %v166_v22 = vadd.f32 %v646_v17, %v165_v21 }
 0x100   :  { %v742_v23 = vpop.f32.mrf.mxu0 }
 0x101   :  { %v170_v25 = vmax.f32 %v166_v22, 0.0 }
 0x103   :  { %v171_v26 = vpack.c.bf16 %v170_v25, %v169_v24 }
 0x105   :  { %760 = vmatmul.mubr.bf16.vlgmr.msra.gmra.mxu1 %v171_v26 }
 0x106   :  { %799 = vmatprep.mubr.msk.bf16.mxu1 %vm959_vm0, %v958_v0  ;;  %784 = vmatpush3.bf16.msra.mxu1 %v850_v30 }
 0x107   :  { %785 = vmatprep.subr.bf16.mxu1 %v958_v0 }
 0x10a   :  { %786 = vmatpush3.bf16.msra.mxu1 %v851_v31 }
 0x10b   :  { %787 = vmatprep.subr.bf16.mxu1 %v958_v0 }
 0x10e   :  { %788 = vmatpush3.bf16.msra.mxu1 %v852_v32 }
 0x10f   :  { %789 = vmatprep.subr.bf16.mxu1 %v958_v0 }
 0x112   :  { %790 = vmatpush3.bf16.msra.mxu1 %v853_v33 }
 0x113   :  { %791 = vmatprep.subr.bf16.mxu1 %v958_v0 }
 0x116   :  { %792 = vmatpush3.bf16.msra.mxu1 %v854_v34 }
 0x117   :  { %793 = vmatprep.subr.bf16.mxu1 %v958_v0 }
 0x11a   :  { %794 = vmatpush3.bf16.msra.mxu1 %v855_v45 }
 0x11b   :  { %795 = vmatprep.subr.bf16.mxu1 %v958_v0 }
 0x11e   :  { %796 = vmatpush3.bf16.msra.mxu1 %v856_v46 }
 0x11f   :  { %797 = vmatprep.subr.bf16.mxu1 %v958_v0 }
 0x122   :  { %798 = vmatpush3.bf16.msra.mxu1 %v857_v47 }
 0x1c5   :  { %v277_v36 = vpop.f32.mrf.mxu1 }
 0x1c6   :  { %v278_v38 = vadd.f32 %v651_v35, %v277_v36 }
 0x1c7   :  { %v761_v37 = vpop.f32.mrf.mxu1 }
 0x1c8   :  { %v284_v42 = vmax.f32 %v278_v38, 0.0 }
 0x1c9   :  { %v280_v39 = vpop.f32.mrf.mxu1 }
 0x1ca   :  { %v281_v40 = vadd.f32 %v651_v35, %v280_v39 }
 0x1cb   :  { %v762_v41 = vpop.f32.mrf.mxu1 }
 0x1cc   :  { %v285_v43 = vmax.f32 %v281_v40, 0.0 }
 0x1ce   :  { %v286_v44 = vpack.c.bf16 %v285_v43, %v284_v42 }
 0x1d0   :  { %780 = vmatmul.mubr.bf16.vlgmr.msra.gmra.mxu0 %v286_v44 }
 0x1d1   :  { %819 = vmatprep.mubr.msk.bf16.mxu0 %vm959_vm0, %v958_v0  ;;  %804 = vmatpush3.bf16.msra.mxu0 %v858_v48 }
 0x1d2   :  { %805 = vmatprep.subr.bf16.mxu0 %v958_v0 }
 0x1d5   :  { %806 = vmatpush3.bf16.msra.mxu0 %v859_v49 }
 0x1d6   :  { %807 = vmatprep.subr.bf16.mxu0 %v958_v0 }
 0x1d9   :  { %808 = vmatpush3.bf16.msra.mxu0 %v860_v50 }
 0x1da   :  { %809 = vmatprep.subr.bf16.mxu0 %v958_v0 }
 0x1dd   :  { %810 = vmatpush3.bf16.msra.mxu0 %v861_v51 }
 0x1de   :  { %811 = vmatprep.subr.bf16.mxu0 %v958_v0 }
 0x1e1   :  { %812 = vmatpush3.bf16.msra.mxu0 %v862_v52 }
 0x1e2   :  { %813 = vmatprep.subr.bf16.mxu0 %v958_v0 }
 0x1e5   :  { %814 = vmatpush3.bf16.msra.mxu0 %v863_v63 }
 0x1e6   :  { %815 = vmatprep.subr.bf16.mxu0 %v958_v0 }
 0x1e9   :  { %816 = vmatpush3.bf16.msra.mxu0 %v864_v1 }
 0x1ea   :  { %817 = vmatprep.subr.bf16.mxu0 %v958_v0  ;;  %v678_v0 = vld [vmem:[%s1125_s10] ss:$0 sm:$0xff] }
 0x1ed   :  { %818 = vmatpush3.bf16.msra.mxu0 %v865_v2 }
 0x290   :  { %v392_v54 = vpop.f32.mrf.mxu0 }
 0x291   :  { %v393_v56 = vadd.f32 %v660_v53, %v392_v54 }
 0x292   :  { %v781_v55 = vpop.f32.mrf.mxu0 }
 0x293   :  { %v399_v60 = vmax.f32 %v393_v56, 0.0 }
 0x294   :  { %v395_v57 = vpop.f32.mrf.mxu0 }
 0x295   :  { %v396_v58 = vadd.f32 %v660_v53, %v395_v57 }
 0x296   :  { %v782_v59 = vpop.f32.mrf.mxu0 }
 0x297   :  { %v400_v61 = vmax.f32 %v396_v58, 0.0 }
 0x299   :  { %v401_v62 = vpack.c.bf16 %v400_v61, %v399_v60 }
 0x29b   :  { %800 = vmatmul.mubr.bf16.vlgmr.msra.gmra.mxu1 %v401_v62 }
 0x35b   :  { %v507_v4 = vpop.f32.mrf.mxu1 }
 0x35c   :  { %v508_v6 = vadd.f32 %v669_v3, %v507_v4 }
 0x35d   :  { %v801_v5 = vpop.f32.mrf.mxu1 }
 0x35e   :  { %v514_v10 = vmax.f32 %v508_v6, 0.0 }
 0x35f   :  { %v510_v7 = vpop.f32.mrf.mxu1 }
 0x360   :  { %v511_v8 = vadd.f32 %v669_v3, %v510_v7 }
 0x361   :  { %v802_v9 = vpop.f32.mrf.mxu1 }
 0x362   :  { %v515_v11 = vmax.f32 %v511_v8, 0.0 }
 0x364   :  { %v516_v12 = vpack.c.bf16 %v515_v11, %v514_v10 }
 0x366   :  { %820 = vmatmul.mubr.bf16.vlgmr.msra.gmra.mxu0 %v516_v12 }
 0x426   :  { %v622_v13 = vpop.f32.mrf.mxu0 }
 0x427   :  { %v623_v16 = vadd.f32 %v678_v0, %v622_v13 }
 0x428   :  { %v821_v14 = vpop.f32.mrf.mxu0 }
 0x42a   :  { %v625_v15 = vpop.f32.mrf.mxu0 }
 0x42b   :  { %v626_v17 = vadd.f32 %v678_v0, %v625_v15 }
 0x42c   :  { %v822_v18 = vpop.f32.mrf.mxu0 }
 0x42d   :  { %v694_v19 = vpack.c.bf16 %v626_v17, %v623_v16 }
 0x42f   :  { %695 = vst [vmem:[%s1126_s11] sm:$0xff] %v694_v19  }
 0x430   :  { %643 = vsyncpa [#allocation3], 1 }
 0x431   :  { %644 = vsyncpa [#allocation5], 1 }
 0x432   :  { %645 = vsyncpa [#allocation8], 1 }

</bundles_post_ra>
